<compile_context>
chip_gen: v7x
topology: tpu7x:2x2x1
jax: 0.10.0
libtpu: 0.0.40
codegen_flags: <defaults>
</compile_context>

<pallas_src>
import functools
import math

import jax
import jax.numpy as jnp
from jax import lax
from jax.experimental import pallas as pl
from jax.experimental.pallas import tpu as pltpu


def _round_up(x, m):
    return (x + m - 1) // m * m


def _vmem_capacity_bytes():
    """Per-core VMEM capacity; falls back to the smallest (v7x) if unknown."""
    try:
        return int(pltpu.get_tpu_info().vmem_capacity_bytes)
    except Exception:
        return 64 * 1024 * 1024


def _glu_kernel(x_ref, w_ref, b_ref, o_ref, acc_ref, *, n_pad, n_out,
                compute_dtype):
    """One (M-tile, K-tile) step of y = (x@Wl^T+bl) * sigmoid(x@Wr^T+br).

    x_ref  : (TM, TK)        activation tile (original dtype)
    w_ref  : (TK, 2*n_pad)   fused [Wl^T | Wr^T] slab slice, lane-dense
    b_ref  : (1, 2*n_pad)    fused [bl, br] in f32 (grid-invariant)
    o_ref  : (TM, n_out)     output tile at true width
    acc_ref: (TM, 2*n_pad)   f32 VMEM accumulator (scratch)
    """
    k = pl.program_id(1)

    @pl.when(k == 0)
    def _init():
        acc_ref[...] = jnp.zeros_like(acc_ref)

    x = x_ref[...]
    if compute_dtype is not None:
        # Cast in-kernel: x travels HBM->VMEM once in its original dtype.
        x = x.astype(compute_dtype)

    acc_ref[...] += lax.dot_general(
        x, w_ref[...],
        dimension_numbers=(((1,), (0,)), ((), ())),
        preferred_element_type=jnp.float32)

    @pl.when(k == pl.num_programs(1) - 1)
    def _finalize():
        acc = acc_ref[...] + b_ref[...]          # f32 epilogue
        left = acc[:, :n_pad]                    # lane-aligned split
        gate = jax.nn.sigmoid(acc[:, n_pad:])
        y = left * gate
        o_ref[...] = y[:, :n_out].astype(o_ref.dtype)


def glu_pallas(x, w_left, b_left, w_right, b_right, *,
               block_m=1024, matmul_dtype=None):
    """Gated linear unit forward.

    x        : (..., in_features)
    w_left   : (out_features, in_features)   (PyTorch nn.Linear layout)
    b_left   : (out_features,)
    w_right  : (out_features, in_features)
    b_right  : (out_features,)
    matmul_dtype : None (full precision, default) or e.g. jnp.bfloat16 to
                   narrow the MXU operands (f32 accumulation either way).
    returns  : (..., out_features), dtype of x
    """
    orig_dtype = x.dtype
    k_dim = x.shape[-1]
    n_out = w_left.shape[0]
    lead_shape = x.shape[:-1]
    m = math.prod(lead_shape) if lead_shape else 1
    x2d = x.reshape(m, k_dim)                    # metadata-only reshape

    # Pad each projection's output dim up to a multiple of 128 so the fused
    # (K, 2*n_pad) weight slab and the f32 accumulator are lane-dense and the
    # left/gate split lands on a lane boundary.  The *output* is written at
    # its true width (masked store beats 4x write traffic + a slice pass for
    # tiny N, and is identical when n_out is already a multiple of 128).
    n_pad = _round_up(n_out, 128)
    two_n = 2 * n_pad

    w_dtype = matmul_dtype if matmul_dtype is not None else w_left.dtype
    x_isz = jnp.dtype(orig_dtype).itemsize
    w_isz = jnp.dtype(w_dtype).itemsize
    o_isz = jnp.dtype(orig_dtype).itemsize

    # ---- generation-aware tile selection / VMEM budget ---------------------
    vmem_cap = _vmem_capacity_bytes()
    budget = int(0.80 * vmem_cap)

    # Big tiles amortize the ~0.35us/step overhead, but keep grid_m >= 2 so a
    # megacore/v7x "parallel" M axis gives both TensorCores work.
    tm = min(block_m, max(8, _round_up(pl.cdiv(m, 2), 8)))

    def working_set(tm_, tk_, n_w_buf):
        return (2 * tm_ * tk_ * x_isz            # activation tiles (x2 buffers)
                + 2 * tm_ * n_out * o_isz        # output tiles (x2 buffers)
                + n_w_buf * tk_ * two_n * w_isz  # weight slab
                + two_n * 4                      # fused bias (f32, x1 buffer)
                + tm_ * two_n * 4)               # f32 accumulator scratch

    tk = k_dim
    k_tiled = False
    while True:
        ws = working_set(tm, tk, 2 if k_tiled else 1)
        if ws <= budget:
            break
        if not k_tiled and k_dim > 256:
            k_tiled = True                       # K-tile before shrinking tm
            tk = max(128, _round_up(pl.cdiv(k_dim, 2), 128))
        elif k_tiled and tk > 128:
            tk = max(128, _round_up(tk // 2, 128))
        elif tm > 8:
            tm = max(8, _round_up(tm // 2, 8))
        else:
            break                                # give up; clamp limit below
    vmem_limit = int(min(max(ws * 5 // 4, 32 * 1024 * 1024),
                         int(0.85 * vmem_cap)))

    grid_m = pl.cdiv(m, tm)
    grid_k = pl.cdiv(k_dim, tk)
    k_pad = grid_k * tk

    # ---- one-time weight/bias packing (small, reused across all tiles) -----
    def _to_slab(w):                             # (N, K) -> (k_pad, n_pad)
        wt = jnp.transpose(w)
        return jnp.pad(wt, ((0, k_pad - k_dim), (0, n_pad - n_out)))

    w_fused = jnp.concatenate([_to_slab(w_left), _to_slab(w_right)], axis=1)
    if matmul_dtype is not None:
        w_fused = w_fused.astype(matmul_dtype)   # pre-cast once; reused per tile

    b_fused = jnp.concatenate([
        jnp.pad(b_left.astype(jnp.float32), (0, n_pad - n_out)),
        jnp.pad(b_right.astype(jnp.float32), (0, n_pad - n_out)),
    ]).reshape(1, two_n)

    if k_pad != k_dim:
        # Rare huge-K fallback only: zero-pad K so partial reduction tiles
        # never fold out-of-bounds garbage into the accumulator.
        x2d = jnp.pad(x2d, ((0, 0), (0, k_pad - k_dim)))

    kernel = functools.partial(_glu_kernel, n_pad=n_pad, n_out=n_out,
                               compute_dtype=matmul_dtype)

    def build(use_buffered):
        def invariant_spec(block_shape, index_map):
            if use_buffered:
                return pl.BlockSpec(block_shape, index_map,
                                    pipeline_mode=pl.Buffered(1))
            return pl.BlockSpec(block_shape, index_map)

        if grid_k == 1:
            # Weight slab is grid-invariant -> single-buffer it (halves its
            # VMEM footprint; matters most on v7x's 64 MiB VMEM).
            w_spec = invariant_spec((tk, two_n), lambda i, k: (k, 0))
        else:
            w_spec = pl.BlockSpec((tk, two_n), lambda i, k: (k, 0))
        b_spec = invariant_spec((1, two_n), lambda i, k: (0, 0))

        return pl.pallas_call(
            kernel,
            out_shape=jax.ShapeDtypeStruct((m, n_out), orig_dtype),
            grid_spec=pltpu.PrefetchScalarGridSpec(
                num_scalar_prefetch=0,
                grid=(grid_m, grid_k),
                in_specs=[
                    pl.BlockSpec((tm, tk), lambda i, k: (i, k)),
                    w_spec,
                    b_spec,
                ],
                out_specs=pl.BlockSpec((tm, n_out), lambda i, k: (i, 0)),
                scratch_shapes=[pltpu.VMEM((tm, two_n), jnp.float32)],
            ),
            compiler_params=pltpu.CompilerParams(
                dimension_semantics=("parallel", "arbitrary"),
                vmem_limit_bytes=vmem_limit,
            ),
        )

    try:
        out2d = build(use_buffered=True)(x2d, w_fused, b_fused)
    except Exception:
        # Fallback for jax builds without pl.Buffered / pipeline_mode support.
        out2d = build(use_buffered=False)(x2d, w_fused, b_fused)

    return out2d.reshape(*lead_shape, n_out)


def glu_reference(x, w_left, b_left, w_right, b_right):
    """Pure-JAX reference mirroring the PyTorch forward."""
    left = jnp.einsum("...k,nk->...n", x, w_left) + b_left
    right = jnp.einsum("...k,nk->...n", x, w_right) + b_right
    return left * jax.nn.sigmoid(right)


if __name__ == "__main__":
    key = jax.random.PRNGKey(0)
    batch, seq = 2, 8
    input_channel, output_channel = 32, 32

    k_x, k_wl, k_bl, k_wr, k_br = jax.random.split(key, 5)

    x = jax.random.normal(k_x, (batch, seq, input_channel), dtype=jnp.float32)

    # PyTorch nn.Linear init: U(-1/sqrt(in), 1/sqrt(in)).
    bound = 1.0 / math.sqrt(input_channel)
    w_left = jax.random.uniform(
        k_wl, (output_channel, input_channel), minval=-bound, maxval=bound,
        dtype=jnp.float32)
    b_left = jax.random.uniform(
        k_bl, (output_channel,), minval=-bound, maxval=bound,
        dtype=jnp.float32)
    w_right = jax.random.uniform(
        k_wr, (output_channel, input_channel), minval=-bound, maxval=bound,
        dtype=jnp.float32)
    b_right = jax.random.uniform(
        k_br, (output_channel,), minval=-bound, maxval=bound,
        dtype=jnp.float32)

    ref_f32 = glu_reference(x, w_left, b_left, w_right, b_right)

    # 1) Default full-precision path (matches the f32 nn.Linear layers).
    #    m=16, tm=8 -> 2-step "parallel" M grid exercised.
    out = glu_pallas(x, w_left, b_left, w_right, b_right)
    out = jax.block_until_ready(out)
    assert out.shape == (batch, seq, output_channel), out.shape
    assert jnp.allclose(out, ref_f32, atol=1e-5, rtol=1e-5), \
        f"max abs err (f32 path) = {jnp.max(jnp.abs(out - ref_f32))}"

    # 2) Opt-in bf16 MXU operands (f32 accumulation / epilogue).
    out_bf16 = glu_pallas(x, w_left, b_left, w_right, b_right,
                          block_m=8, matmul_dtype=jnp.bfloat16)
    out_bf16 = jax.block_until_ready(out_bf16)
    to_bf16 = lambda a: a.astype(jnp.bfloat16).astype(jnp.float32)
    ref_bf16 = glu_reference(to_bf16(x), to_bf16(w_left), b_left,
                             to_bf16(w_right), b_right)
    assert jnp.allclose(out_bf16, ref_bf16, atol=1e-4, rtol=1e-4), \
        f"max abs err (bf16 ref) = {jnp.max(jnp.abs(out_bf16 - ref_bf16))}"
    assert jnp.allclose(out_bf16, ref_f32, atol=5e-2, rtol=5e-2), \
        f"max abs err (f32 ref) = {jnp.max(jnp.abs(out_bf16 - ref_f32))}"

    print("KERNEL_OK")
</pallas_src>

<mosaic_0001>
module attributes {stable_mosaic.version = 11 : i64} {
  func.func @_glu_kernel(%arg0: i32, %arg1: i32, %arg2: memref<8x32xf32, #tpu.memory_space<vmem>>, %arg3: memref<32x256xf32, #tpu.memory_space<vmem>>, %arg4: memref<1x256xf32, #tpu.memory_space<vmem>>, %arg5: memref<8x32xf32, #tpu.memory_space<vmem>>, %arg6: memref<8x256xf32, #tpu.memory_space<vmem>>) attributes {dimension_semantics = [#tpu.dimension_semantics<parallel>, #tpu.dimension_semantics<arbitrary>], iteration_bounds = array<i64: 2, 1>, scalar_prefetch = 0 : i64, scratch_operands = 1 : i64, tpu.core_type = #tpu.core_type<tc>, window_params = [{transform_indices = @transform_0, window_bounds = array<i64: 8, 32>}, {pipeline_mode = #tpu.pipeline_mode<synchronous>, transform_indices = @transform_1, window_bounds = array<i64: 32, 256>}, {pipeline_mode = #tpu.pipeline_mode<synchronous>, transform_indices = @transform_2, window_bounds = array<i64: 1, 256>}, {transform_indices = @transform_3, window_bounds = array<i64: 8, 32>}]} {
    %c0_i32 = arith.constant 0 : i32
    %0 = arith.cmpi eq, %arg1, %c0_i32 : i32
    %1 = arith.extui %0 : i1 to i32
    %c0_i32_0 = arith.constant 0 : i32
    %2 = arith.cmpi ne, %1, %c0_i32_0 : i32
    scf.if %2 {
      %cst_10 = arith.constant 0.000000e+00 : f32
      %12 = vector.broadcast %cst_10 : f32 to vector<8x256xf32>
      %c0_11 = arith.constant 0 : index
      %c0_12 = arith.constant 0 : index
      %13 = vector.load %arg6[%c0_11, %c0_12] : memref<8x256xf32, #tpu.memory_space<vmem>>, vector<8x256xf32>
      tpu.vector_store %arg6[%c0_11, %c0_12], %12 {strides = array<i32>} : memref<8x256xf32, #tpu.memory_space<vmem>>, vector<8x256xf32>,
    } else {
    }
    %c0 = arith.constant 0 : index
    %c0_1 = arith.constant 0 : index
    %3 = vector.load %arg2[%c0, %c0_1] : memref<8x32xf32, #tpu.memory_space<vmem>>, vector<8x32xf32>
    %c0_2 = arith.constant 0 : index
    %c0_3 = arith.constant 0 : index
    %4 = vector.load %arg6[%c0_2, %c0_3] : memref<8x256xf32, #tpu.memory_space<vmem>>, vector<8x256xf32>
    %c0_4 = arith.constant 0 : index
    %c0_5 = arith.constant 0 : index
    %5 = vector.load %arg3[%c0_4, %c0_5] : memref<32x256xf32, #tpu.memory_space<vmem>>, vector<32x256xf32>
    %cst = arith.constant dense<0.000000e+00> : vector<8x256xf32>
    %6 = tpu.matmul %3, %5, %cst {dimension_numbers = #tpu.dot_dimension_numbers<[1], [0], [0], [1], [0, 0, 1, 1], [], []>} : vector<8x32xf32>, vector<32x256xf32>, vector<8x256xf32> -> vector<8x256xf32>
    %7 = arith.addf %4, %6 : vector<8x256xf32>
    %c0_6 = arith.constant 0 : index
    %c0_7 = arith.constant 0 : index
    %8 = vector.load %arg6[%c0_6, %c0_7] : memref<8x256xf32, #tpu.memory_space<vmem>>, vector<8x256xf32>
    tpu.vector_store %arg6[%c0_6, %c0_7], %7 {strides = array<i32>} : memref<8x256xf32, #tpu.memory_space<vmem>>, vector<8x256xf32>,
    %c0_i32_8 = arith.constant 0 : i32
    %9 = arith.cmpi eq, %arg1, %c0_i32_8 : i32
    %10 = arith.extui %9 : i1 to i32
    %c0_i32_9 = arith.constant 0 : i32
    %11 = arith.cmpi ne, %10, %c0_i32_9 : i32
    scf.if %11 {
      %c0_10 = arith.constant 0 : index
      %c0_11 = arith.constant 0 : index
      %12 = vector.load %arg6[%c0_10, %c0_11] : memref<8x256xf32, #tpu.memory_space<vmem>>, vector<8x256xf32>
      %c0_12 = arith.constant 0 : index
      %c0_13 = arith.constant 0 : index
      %13 = vector.load %arg4[%c0_12, %c0_13] : memref<1x256xf32, #tpu.memory_space<vmem>>, vector<1x256xf32>
      %14 = vector.broadcast %13 : vector<1x256xf32> to vector<8x256xf32>
      %15 = arith.addf %12, %14 : vector<8x256xf32>
      %16 = vector.extract_strided_slice %15 {offsets = [0, 0], sizes = [8, 128], strides = [1, 1]} : vector<8x256xf32> to vector<8x128xf32>
      %17 = vector.extract_strided_slice %15 {offsets = [0, 128], sizes = [8, 128], strides = [1, 1]} : vector<8x256xf32> to vector<8x128xf32>
      %18 = arith.negf %17 : vector<8x128xf32>
      %19 = math.exp %18 : vector<8x128xf32>
      %cst_14 = arith.constant 1.000000e+00 : f32
      %20 = vector.broadcast %cst_14 : f32 to vector<8x128xf32>
      %21 = arith.addf %20, %19 : vector<8x128xf32>
      %22 = arith.divf %20, %21 : vector<8x128xf32>
      %23 = arith.mulf %16, %22 : vector<8x128xf32>
      %24 = vector.extract_strided_slice %23 {offsets = [0, 0], sizes = [8, 32], strides = [1, 1]} : vector<8x128xf32> to vector<8x32xf32>
      %c0_15 = arith.constant 0 : index
      %c0_16 = arith.constant 0 : index
      %25 = vector.load %arg5[%c0_15, %c0_16] : memref<8x32xf32, #tpu.memory_space<vmem>>, vector<8x32xf32>
      tpu.vector_store %arg5[%c0_15, %c0_16], %24 {strides = array<i32>} : memref<8x32xf32, #tpu.memory_space<vmem>>, vector<8x32xf32>,
    } else {
    }
    return
  }
  func.func @transform_0(%arg0: i32, %arg1: i32) -> (i32, i32) {
    %c0_i32 = arith.constant 0 : i32
    return %arg0, %arg1 : i32, i32
  }
  func.func @transform_1(%arg0: i32, %arg1: i32) -> (i32, i32) {
    %c0_i32 = arith.constant 0 : i32
    %c0_i32_0 = arith.constant 0 : i32
    return %arg1, %c0_i32 : i32, i32
  }
  func.func @transform_2(%arg0: i32, %arg1: i32) -> (i32, i32) {
    %c0_i32 = arith.constant 0 : i32
    %c0_i32_0 = arith.constant 0 : i32
    %c0_i32_1 = arith.constant 0 : i32
    return %c0_i32, %c0_i32_0 : i32, i32
  }
  func.func @transform_3(%arg0: i32, %arg1: i32) -> (i32, i32) {
    %c0_i32 = arith.constant 0 : i32
    %c0_i32_0 = arith.constant 0 : i32
    return %arg0, %c0_i32 : i32, i32
  }
}

module attributes {stable_mosaic.version = 11 : i64} {
  func.func @_glu_kernel(%arg0: i32, %arg1: i32, %arg2: memref<8x32xf32, #tpu.memory_space<vmem>>, %arg3: memref<32x256xf32, #tpu.memory_space<vmem>>, %arg4: memref<1x256xf32, #tpu.memory_space<vmem>>, %arg5: memref<8x32xf32, #tpu.memory_space<vmem>>, %arg6: memref<8x256xf32, #tpu.memory_space<vmem>>) attributes {dimension_semantics = [#tpu.dimension_semantics<parallel>, #tpu.dimension_semantics<arbitrary>], iteration_bounds = array<i64: 2, 1>, scalar_prefetch = 0 : i64, scratch_operands = 1 : i64, tpu.core_type = #tpu.core_type<tc>, window_params = [{transform_indices = @transform_0, window_bounds = array<i64: 8, 32>}, {transform_indices = @transform_1, window_bounds = array<i64: 32, 256>}, {pipeline_mode = #tpu.pipeline_mode<synchronous>, transform_indices = @transform_2, window_bounds = array<i64: 1, 256>}, {transform_indices = @transform_3, window_bounds = array<i64: 8, 32>}]} {
    %c0_i32 = arith.constant 0 : i32
    %0 = arith.cmpi eq, %arg1, %c0_i32 : i32
    %1 = arith.extui %0 : i1 to i32
    %c0_i32_0 = arith.constant 0 : i32
    %2 = arith.cmpi ne, %1, %c0_i32_0 : i32
    scf.if %2 {
      %cst_10 = arith.constant 0.000000e+00 : f32
      %12 = vector.broadcast %cst_10 : f32 to vector<8x256xf32>
      %c0_11 = arith.constant 0 : index
      %c0_12 = arith.constant 0 : index
      %13 = vector.load %arg6[%c0_11, %c0_12] : memref<8x256xf32, #tpu.memory_space<vmem>>, vector<8x256xf32>
      tpu.vector_store %arg6[%c0_11, %c0_12], %12 {strides = array<i32>} : memref<8x256xf32, #tpu.memory_space<vmem>>, vector<8x256xf32>,
    } else {
    }
    %c0 = arith.constant 0 : index
    %c0_1 = arith.constant 0 : index
    %3 = vector.load %arg2[%c0, %c0_1] : memref<8x32xf32, #tpu.memory_space<vmem>>, vector<8x32xf32>
    %c0_2 = arith.constant 0 : index
    %c0_3 = arith.constant 0 : index
    %4 = vector.load %arg6[%c0_2, %c0_3] : memref<8x256xf32, #tpu.memory_space<vmem>>, vector<8x256xf32>
    %c0_4 = arith.constant 0 : index
    %c0_5 = arith.constant 0 : index
    %5 = vector.load %arg3[%c0_4, %c0_5] : memref<32x256xf32, #tpu.memory_space<vmem>>, vector<32x256xf32>
    %cst = arith.constant dense<0.000000e+00> : vector<8x256xf32>
    %6 = tpu.matmul %3, %5, %cst {dimension_numbers = #tpu.dot_dimension_numbers<[1], [0], [0], [1], [0, 0, 1, 1], [], []>} : vector<8x32xf32>, vector<32x256xf32>, vector<8x256xf32> -> vector<8x256xf32>
    %7 = arith.addf %4, %6 : vector<8x256xf32>
    %c0_6 = arith.constant 0 : index
    %c0_7 = arith.constant 0 : index
    %8 = vector.load %arg6[%c0_6, %c0_7] : memref<8x256xf32, #tpu.memory_space<vmem>>, vector<8x256xf32>
    tpu.vector_store %arg6[%c0_6, %c0_7], %7 {strides = array<i32>} : memref<8x256xf32, #tpu.memory_space<vmem>>, vector<8x256xf32>,
    %c0_i32_8 = arith.constant 0 : i32
    %9 = arith.cmpi eq, %arg1, %c0_i32_8 : i32
    %10 = arith.extui %9 : i1 to i32
    %c0_i32_9 = arith.constant 0 : i32
    %11 = arith.cmpi ne, %10, %c0_i32_9 : i32
    scf.if %11 {
      %c0_10 = arith.constant 0 : index
      %c0_11 = arith.constant 0 : index
      %12 = vector.load %arg6[%c0_10, %c0_11] : memref<8x256xf32, #tpu.memory_space<vmem>>, vector<8x256xf32>
      %c0_12 = arith.constant 0 : index
      %c0_13 = arith.constant 0 : index
      %13 = vector.load %arg4[%c0_12, %c0_13] : memref<1x256xf32, #tpu.memory_space<vmem>>, vector<1x256xf32>
      %14 = vector.broadcast %13 : vector<1x256xf32> to vector<8x256xf32>
      %15 = arith.addf %12, %14 : vector<8x256xf32>
      %16 = vector.extract_strided_slice %15 {offsets = [0, 0], sizes = [8, 128], strides = [1, 1]} : vector<8x256xf32> to vector<8x128xf32>
      %17 = vector.extract_strided_slice %15 {offsets = [0, 128], sizes = [8, 128], strides = [1, 1]} : vector<8x256xf32> to vector<8x128xf32>
      %18 = arith.negf %17 : vector<8x128xf32>
      %19 = math.exp %18 : vector<8x128xf32>
      %cst_14 = arith.constant 1.000000e+00 : f32
      %20 = vector.broadcast %cst_14 : f32 to vector<8x128xf32>
      %21 = arith.addf %20, %19 : vector<8x128xf32>
      %22 = arith.divf %20, %21 : vector<8x128xf32>
      %23 = arith.mulf %16, %22 : vector<8x128xf32>
      %24 = vector.extract_strided_slice %23 {offsets = [0, 0], sizes = [8, 32], strides = [1, 1]} : vector<8x128xf32> to vector<8x32xf32>
      %c0_15 = arith.constant 0 : index
      %c0_16 = arith.constant 0 : index
      %25 = vector.load %arg5[%c0_15, %c0_16] : memref<8x32xf32, #tpu.memory_space<vmem>>, vector<8x32xf32>
      tpu.vector_store %arg5[%c0_15, %c0_16], %24 {strides = array<i32>} : memref<8x32xf32, #tpu.memory_space<vmem>>, vector<8x32xf32>,
    } else {
    }
    return
  }
  func.func @transform_0(%arg0: i32, %arg1: i32) -> (i32, i32) {
    %c0_i32 = arith.constant 0 : i32
    return %arg0, %arg1 : i32, i32
  }
  func.func @transform_1(%arg0: i32, %arg1: i32) -> (i32, i32) {
    %c0_i32 = arith.constant 0 : i32
    %c0_i32_0 = arith.constant 0 : i32
    return %arg1, %c0_i32 : i32, i32
  }
  func.func @transform_2(%arg0: i32, %arg1: i32) -> (i32, i32) {
    %c0_i32 = arith.constant 0 : i32
    %c0_i32_0 = arith.constant 0 : i32
    %c0_i32_1 = arith.constant 0 : i32
    return %c0_i32, %c0_i32_0 : i32, i32
  }
  func.func @transform_3(%arg0: i32, %arg1: i32) -> (i32, i32) {
    %c0_i32 = arith.constant 0 : i32
    %c0_i32_0 = arith.constant 0 : i32
    return %arg0, %c0_i32 : i32, i32
  }
}

</mosaic_0001>

<bundles_post_ra>
// kernel: tpu_custom_call.1
= control target key start
LH: loop header
LB: loop body
LE: loop exit
PB: predicated region body
PF: predicated region fallthrough
CT: control target
= control target key end

     0   :  { %8 = vsyncpa [#allocation4], 0  ;;  %s954_s0 = inlined_call_operand.hbm [shape: f32[16,32], index: 0, kind: input, shape index: {}]   ;;  %s955_s1 = inlined_call_operand.hbm [shape: f32[32,256], index: 1, kind: input, shape index: {}]   ;;  %s956_s2 = inlined_call_operand.vmem [shape: f32[1,256], index: 2, kind: input, shape index: {}]   ;;  %s957_s3 = inlined_call_operand.hbm [shape: f32[16,32], index: 3, kind: output, shape index: {}]  }
   0x1   :  { %10 = vsyncpa [#allocation4 + $0x1], 0 }
   0x2   :  { %11 = vsyncpa [#allocation7], 0 }
   0x3   :  { %12 = vsyncpa [#allocation5], 0 }
   0x4   :  { %14 = vsyncpa [#allocation5 + $0x1], 0  ;;  %s731_s12 = smov 0   ;;  %s733_s13 = smov 0  }
   0x5   :  { %s735_s14 = smov 0   ;;  %s737_s15 = smov 0  }
   0x6   :  { %s739_s16 = smov 0   ;;  %s741_s17 = smov 0  }
   0x7 LB: > { %s454_s18 = sadd.s32 4294967295, %s703_s17   ;;  %s455_s19 = sadd.s32 4294967294, %s703_s17   ;;  %s703_s17 = sphi %s741_s17, %s20_s17   ;;  %s699_s16 = sphi %s739_s16, %s981_s16   ;;  %s695_s15 = sphi %s737_s15, %s980_s15   ;;  %s691_s14 = sphi %s735_s14, %s979_s14   ;;  %s687_s13 = sphi %s733_s13, %s978_s13   ;;  %s683_s12 = sphi %s731_s12, %s977_s12  }
   0x8   : > { %p54_p0 = scmp.ne.s32.totalorder %s687_s13, %s683_s12  ;;  %p765_p1 = scmp.eq.s32.totalorder %s454_s18, 0 }
   0x9   : > { %p769_p2 = scmp.eq.s32.totalorder %s454_s18, 1  ;;  %p131_p3 = scmp.eq.s32.totalorder %s455_s19, 1 }
   0xa   : > { %s962_s20 = scalar_select %p765_p1, 1, 0 }
   0xb   : > { %s963_s21 = scalar_select %p769_p2, 1, 0 }
   0xc   : > { %p775_p4 = por %p765_p1, %p54_p0  ;;  %p456_p5 = scmp.ge.s32.totalorder %s703_s17, 1 }
   0xd   : > { %p780_p6 = por %p131_p3, %p54_p0  ;;  %p138_p7 = scmp.lt.s32.totalorder %s703_s17, 3 }
   0xe   : > { %s964_s22 = scalar_select %p775_p4, 1, 0 }
   0xf   : > { %s965_s23 = scalar_select %p780_p6, 1, 0 }
  0x10   : > { %p785_p8 = pnand %p456_p5, %p138_p7  ;;  %s705_s25 = smov [#allocation6]  }
  0x11   : > { %s154_s26 = sshll.u32 %s705_s25, 4  ;;  %s32_s28 = sadd.s32 1, %s699_s16  ;;  %s155_s26 = int_to_ptr.vmem [resolvable:$true] %s154_s26 }
  0x12   : > { %s966_s24 = scalar_select %p785_p8, 1, 0 }
  0x13   : > { %p487_p9 = pneg %p785_p8  ;;  %s559_s4 = scalar_lea.hbm %s955_s1, 1024 }
  0x14   : > { %p560_p12 = scmp.ne.s32.totalorder %s955_s1, %s559_s4  ;;  %p566_p5 = scmp.lt.u32.totalorder %s559_s4, %s955_s1 }
  0x15   : > { %p794_p11 = pnand %p487_p9, %p765_p1 }
  0x17   : > { %p561_p13 = pneg %p794_p11 }
  0x19   : > { %p562_p0 = pnand %p561_p13, %p560_p12 }
  0x1b   : > { %p563_p3 = pneg %p562_p0 }
  0x1d   : > { %p568_p7 = pnand %p566_p5, %p563_p3 }
  0x1f   : > { %571 = shalt.err (!%p568_p7)
}
  0x20   : > { %s572_s9 = scalar_lea.vmem %s155_s26, 1024  ;;  %p580_p1 = scmp.lt.s32.totalorder %s155_s26, %s155_s26 }
  0x21   : > { %p573_p9 = scmp.ne.s32.totalorder %s155_s26, %s572_s9  ;;  %p581_p4 = scmp.lt.s32.totalorder %s572_s9, %s572_s9 }
  0x23   : > { %p575_p10 = pnand %p573_p9, %p561_p13  ;;  %p582_p8 = por %p581_p4, %p580_p1 }
  0x25   : > { %p576_p6 = pneg %p575_p10 }
  0x27   : > { %p583_p2 = pnand %p582_p8, %p576_p6 }
  0x29   : > { %586 = shalt.err (!%p583_p2)
}
  0x2a   : > { %s706_s10 = smov 256   ;;  %s707_s11 = smov 16  }
  0x2b   : > { %490 = dma.hbm_to_vmem [thread:$0]  (!%p794_p11), %s955_s1, 1024, %s155_s26, [#allocation7], %s706_s10, %s706_s10, %s707_s11  }
  0x2c   : > { %p34_p1 = scmp.ge.s32.totalorder %s32_s28, 2  ;;  %s41_s25 = sadd.s32 1, %s691_s14 }
  0x2d   : > { %p48_p2 = scmp.ne.s32.totalorder %s691_s14, %s687_s13  ;;  %p49_p4 = scmp.eq.s32.totalorder %s703_s17, 0 }
  0x2e   : > { %s983_s28 = smov (%p34_p1, %s32_s28), 0  ;;  %p969_p8 = scmp.ne.s32.totalorder %s963_s21, 0 }
  0x2f   : > { %p821_p6 = por %p49_p4, %p48_p2  ;;  %s36_s27 = ssub.s32 %s699_s16, %s983_s28 }
  0x30   : > { %p827_p10 = por %p969_p8, %p48_p2  ;;  %p500_p12 = scmp.lt.s32.totalorder %s703_s17, 2 }
  0x31   : > { %p39_p11 = scmp.eq.s32.totalorder %s36_s27, 0  ;;  %s171_s26 = sand.u32 1, %s691_s14  }
  0x32   : > { %s459_s4 = sshll.u32 %s171_s26, 3  ;;  %s460_s6 = sshll.u32 %s699_s16, 7 }
  0x33   : > { %s836_s5 = scalar_select %p39_p11, %s691_s14, %s41_s25  }
  0x34   : > { %s842_s9 = scalar_lea.hbm %s954_s0, %s460_s6  ;;  %s175_s21 = scalar_lea.vmem [#allocation3], %s459_s4 }
  0x35   : > { %s183_s10 = sshll.u32 %s175_s21, 4  ;;  %p848_p13 = pnand %p500_p12, %p821_p6  ;;  %s844_s10 = int_to_ptr.vmem [resolvable:$true] %s183_s10 }
  0x36   : > { %s172_s18 = scalar_lea.sflag [#allocation4], %s171_s26  ;;  %s587_s19 = scalar_lea.hbm %s842_s9, 128 }
  0x37   : > { %p588_p0 = scmp.ne.s32.totalorder %s842_s9, %s587_s19  ;;  %p589_p3 = pneg %p848_p13 }
  0x38   : > { %s592_s4 = scalar_lea.hbm %s954_s0, 256  ;;  %p593_p9 = scmp.lt.u32.totalorder %s842_s9, %s954_s0 }
  0x39   : > { %p590_p5 = pnand %p589_p3, %p588_p0  ;;  %p594_p1 = scmp.lt.u32.totalorder %s592_s4, %s587_s19 }
  0x3a   : > { %p596_p4 = scmp.lt.u32.totalorder %s587_s19, %s842_s9 }
  0x3b   : > { %p591_p7 = pneg %p590_p5  ;;  %p595_p2 = por %p594_p1, %p593_p9 }
  0x3d   : > { %p597_p6 = por %p596_p4, %p595_p2 }
  0x3f   : > { %p598_p8 = pnand %p597_p6, %p591_p7 }
  0x41   : > { %601 = shalt.err (!%p598_p8)
}
  0x42   : > { %s602_s26 = scalar_lea.vmem %s844_s10, 128  ;;  %s708_s7 = smov [#allocation3]  }
  0x43   : > { %p603_p12 = scmp.ne.s32.totalorder %s844_s10, %s602_s26  ;;  %s607_s8 = sshll.u32 %s708_s7, 4  ;;  %s608_s8 = int_to_ptr.vmem [resolvable:$false] %s607_s8 }
  0x44   : > { %s609_s21 = scalar_lea.vmem %s608_s8, 256  ;;  %p610_p5 = scmp.lt.s32.totalorder %s844_s10, %s608_s8 }
  0x45   : > { %p605_p11 = pnand %p603_p12, %p589_p3  ;;  %p611_p9 = scmp.lt.s32.totalorder %s609_s21, %s602_s26 }
  0x47   : > { %p606_p0 = pneg %p605_p11  ;;  %p612_p1 = por %p611_p9, %p610_p5 }
  0x49   : > { %p613_p2 = pnand %p612_p1, %p606_p0 }
  0x4b   : > { %616 = shalt.err (!%p613_p2)
}
  0x4c   : > { %494 = dma.hbm_to_vmem [thread:$0]  (!%p848_p13), %s842_s9, 128, %s844_s10, %s172_s18  }
  0x4d   : > { %p972_p7 = scmp.ne.s32.totalorder %s966_s24, 0 }
  0x4e   : > { %s880_s19 = sand.u32 (!%p972_p7), 1, %s687_s13   ;;  %p973_p3 = scmp.ne.s32.totalorder (!%p972_p7), %s964_s22, 0 }
  0x4f   : > { %192 = sbr.rel (%p972_p7) target bundleno = 358 (0x166), region = 32  ;;  %s462_s25 = sshll.u32 (!%p972_p7), %s880_s19, 3 }
  0x50   : > { %s195_s27 = scalar_lea.sflag (!%p972_p7), [#allocation4], %s880_s19  ;;  %s198_s4 = scalar_lea.vmem (!%p972_p7), [#allocation3], %s462_s25 }
  0x56   : > { %670 = dma.done.wait (%p973_p3), %s195_s27, 128  }
  0x57   : > { %672 = vsyncadd (%p973_p3), %s195_s27, 4294967168  ;;  %p974_p13 = scmp.ne.s32.totalorder %s962_s20, 0 }
  0x59   : > { %674 = dma.done.wait (%p974_p13), [#allocation7], 1024  }
  0x5a   : > { %676 = vsyncadd (%p974_p13), [#allocation7], 4294966272  ;;  %v709_v0 = vmov 0.0   ;;  %v236_v1 = vld [vmem:[#allocation6 + $0x8] sm:$0xff]  ;;  %v238_v2 = vld [vmem:[#allocation6 + $0x18] sm:$0xff]  ;;  %vm243_vm0 = vcmask 261120   ;;  %v329_v14 = vlaneseq }
  0x5b   : > { %311 = vmatprep.mubr.f32.mxu0 %v709_v0  ;;  %v235_v3 = vld [vmem:[#allocation6] sm:$0xff]  ;;  %v471_v4 = vpack.c.bf16 %v238_v2, %v236_v1  ;;  %v237_v5 = vld [vmem:[#allocation6 + $0x10] sm:$0xff]  ;;  %v240_v6 = vld [vmem:[#allocation6 + $0x28] sm:$0xff]  ;;  %s468_s24 = sshll.u32 %s695_s15, 7  ;;  %s224_s9 = scalar_lea.vmem [#allocation8], %s462_s25 }
  0x5c   : > { %v242_v7 = vld [vmem:[#allocation6 + $0x38] sm:$0xff]  ;;  %v473_v8 = vpack.c.bf16 %v237_v5, %v235_v3  ;;  %v239_v10 = vld [vmem:[#allocation6 + $0x20] sm:$0xff]  ;;  %v241_v11 = vld [vmem:[#allocation6 + $0x30] sm:$0xff]  ;;  %v330_v15 = vshrl.u32 %v329_v14, 7  ;;  %s363_s10 = sshll.u32 %s224_s9, 4  ;;  %s904_s29 = scalar_lea.hbm %s957_s3, %s468_s24  ;;  %s906_s10 = int_to_ptr.vmem [resolvable:$true] %s363_s10 }
  0x5d   : > { %v475_v9 = vpack.c.bf16 %v242_v7, %v240_v6  ;;  %472 = vmatprep.subr.bf16.mxu0 %v471_v4  ;;  %v477_v12 = vpack.c.bf16 %v241_v11, %v239_v10  ;;  %v232_v13 = vld [vmem:[%s198_s4] sm:$0xff]  ;;  %s350_s6 = scalar_lea.sflag [#allocation5], %s880_s19  ;;  %s617_s15 = scalar_lea.vmem %s906_s10, 128 }
  0x5e   : > { %474 = vmatpush1.bf16.msra.mxu0 %v473_v8  ;;  %v335_v16 = vsub.s32 1, %v330_v15  ;;  %v327_v17 = vld [vmem:[%s956_s2] sm:$0x3]  ;;  %v331_v25 = vsub.s32 0, %v330_v15  ;;  %p618_p4 = scmp.ne.s32.totalorder %s906_s10, %s617_s15  ;;  %s710_s26 = smov [#allocation8]  }
  0x5f   : > { %476 = vmatprep.subr.bf16.mxu0 %v475_v9  ;;  %s621_s7 = sshll.u32 %s710_s26, 4  ;;  %s622_s7 = int_to_ptr.vmem [resolvable:$false] %s621_s7 }
  0x60   : > { %v336_v18 = vrot.slane %v327_v17, %v335_v16  ;;  %v332_v26 = vrot.slane %v327_v17, %v331_v25  ;;  %p619_p6 = pnand %p618_p4, %p827_p10  ;;  %s623_s8 = scalar_lea.vmem %s622_s7, 256 }
  0x61   : > { %p624_p12 = scmp.lt.s32.totalorder %s906_s10, %s622_s7  ;;  %p625_p11 = scmp.lt.s32.totalorder %s623_s8, %s617_s15 }
  0x62   : > { %478 = vmatpush1.bf16.msra.mxu0 %v477_v12  ;;  %p620_p8 = pneg %p619_p6 }
  0x63   : > { %p626_p0 = por %p625_p11, %p624_p12 }
  0x65   : > { %465 = vmatmul.mubr.msk.f32.vlgmr.msra.gmra.mrb[0].mxu0 %vm243_vm0, %v232_v13  ;;  %p627_p5 = pnand %p626_p0, %p620_p8 }
 0x138   : > { %v313_v19 = vpop.f32.mrb[0].mxu0 }
 0x139   : > { %v315_v20 = vpop.f32.mrb[1].mxu0  ;;  %v339_v27 = vadd.f32 %v332_v26, %v313_v19 }
 0x13a   : > { %v340_v21 = vadd.f32 %v336_v18, %v315_v20 }
 0x13c   : > { %v466_v22 = vmul.f32 -1.442695, %v340_v21 }
 0x13e   : > { %555 = vpow2.f32 %v466_v22 }
 0x148   : > { %v556_v23 = vpop.eup %555 }
 0x149   : > { %v344_v24 = vadd.f32 1.0, %v556_v23 }
 0x14b   : > { %557 = vrcp.f32 %v344_v24 }
 0x155   : > { %v558_v28 = vpop.eup %557 }
 0x156   : > { %v347_v29 = vmul.f32 %v558_v28, %v339_v27 }
 0x158   : > { %348 = vst.msk [vmem:[%s224_s9] sm:$0xff] %vm243_vm0, %v347_v29 }
 0x159   : > { %630 = shalt.err (!%p627_p5)
}
 0x15a   : > { %s631_s21 = scalar_lea.hbm %s904_s29, 128  ;;  %s635_s27 = scalar_lea.hbm %s957_s3, 256 }
 0x15b   : > { %p632_p9 = scmp.ne.s32.totalorder %s904_s29, %s631_s21  ;;  %p636_p7 = scmp.lt.u32.totalorder %s904_s29, %s957_s3 }
 0x15c   : > { %p637_p3 = scmp.lt.u32.totalorder %s635_s27, %s631_s21  ;;  %p639_p4 = scmp.lt.u32.totalorder %s631_s21, %s904_s29 }
 0x15d   : > { %p633_p1 = pnand %p632_p9, %p827_p10 }
 0x15e   : > { %p638_p13 = por %p637_p3, %p636_p7 }
 0x15f   : > { %p634_p2 = pneg %p633_p1 }
 0x160   : > { %p640_p6 = por %p639_p4, %p638_p13 }
 0x162   : > { %p641_p8 = pnand %p640_p6, %p634_p2 }
 0x164   : > { %644 = shalt.err (!%p641_p8)
}
 0x165   : > { %485 = dma.vmem_to_hbm [thread:$0]  (%p827_p10), %s906_s10, 128, %s904_s29, %s350_s6  }
 0x166 PF: > { %s375_s22 = sand.u32 1, %s683_s12   ;;  %p975_p12 = scmp.ne.s32.totalorder %s965_s23, 0 }
 0x167   : > { %p976_p11 = scmp.ge.s32.totalorder %s703_s17, 2  ;;  %s376_s24 = scalar_lea.sflag [#allocation5], %s375_s22 }
 0x169   : > { %p496_p0 = pnand %p976_p11, %p975_p12 }
 0x16b   : > { %678 = dma.done.wait (!%p496_p0), %s376_s24, 128  }
 0x16c   : > { %680 = vsyncadd (!%p496_p0), %s376_s24, 4294967168  ;;  %s20_s17 = sadd.s32 1, %s703_s17   ;;  %s977_s12 = smov %s687_s13 }
 0x16d   : > { %p17_p5 = scmp.ge.s32.totalorder %s20_s17, 4   ;;  %s978_s13 = smov %s691_s14 }
 0x16e   : > { %s979_s14 = smov %s836_s5  ;;  %s980_s15 = smov %s699_s16 }
 0x16f   : > { %s981_s16 = smov %s983_s28  ;;  %19 = sbr.rel (!%p17_p5) target bundleno = 7 (0x7), region = 90 }
 0x176   :  { %381 = vsyncpa [#allocation4], 1 }
 0x177   :  { %383 = vsyncpa [#allocation4 + $0x1], 1 }
 0x178   :  { %384 = vsyncpa [#allocation7], 1 }
 0x179   :  { %385 = vsyncpa [#allocation5], 1 }
 0x17a   :  { %387 = vsyncpa [#allocation5 + $0x1], 1 }

// kernel: tpu_custom_call.1
= control target key start
LH: loop header
LB: loop body
LE: loop exit
PB: predicated region body
PF: predicated region fallthrough
CT: control target
= control target key end

     0   :  { %8 = vsyncpa [#allocation4], 0  ;;  %s954_s0 = inlined_call_operand.hbm [shape: f32[16,32], index: 0, kind: input, shape index: {}]   ;;  %s955_s1 = inlined_call_operand.hbm [shape: f32[32,256], index: 1, kind: input, shape index: {}]   ;;  %s956_s2 = inlined_call_operand.vmem [shape: f32[1,256], index: 2, kind: input, shape index: {}]   ;;  %s957_s3 = inlined_call_operand.hbm [shape: f32[16,32], index: 3, kind: output, shape index: {}]  }
   0x1   :  { %10 = vsyncpa [#allocation4 + $0x1], 0 }
   0x2   :  { %11 = vsyncpa [#allocation7], 0 }
   0x3   :  { %12 = vsyncpa [#allocation5], 0 }
   0x4   :  { %14 = vsyncpa [#allocation5 + $0x1], 0  ;;  %s731_s12 = smov 0   ;;  %s733_s13 = smov 0  }
   0x5   :  { %s735_s14 = smov 0   ;;  %s737_s15 = smov 0  }
   0x6   :  { %s739_s16 = smov 0   ;;  %s741_s17 = smov 0  }
   0x7 LB: > { %s454_s18 = sadd.s32 4294967295, %s703_s17   ;;  %s455_s19 = sadd.s32 4294967294, %s703_s17   ;;  %s703_s17 = sphi %s741_s17, %s20_s17   ;;  %s699_s16 = sphi %s739_s16, %s981_s16   ;;  %s695_s15 = sphi %s737_s15, %s980_s15   ;;  %s691_s14 = sphi %s735_s14, %s979_s14   ;;  %s687_s13 = sphi %s733_s13, %s978_s13   ;;  %s683_s12 = sphi %s731_s12, %s977_s12  }
   0x8   : > { %p54_p0 = scmp.ne.s32.totalorder %s687_s13, %s683_s12  ;;  %p765_p1 = scmp.eq.s32.totalorder %s454_s18, 0 }
   0x9   : > { %p769_p2 = scmp.eq.s32.totalorder %s454_s18, 1  ;;  %p131_p3 = scmp.eq.s32.totalorder %s455_s19, 1 }
   0xa   : > { %s962_s20 = scalar_select %p765_p1, 1, 0 }
   0xb   : > { %s963_s21 = scalar_select %p769_p2, 1, 0 }
   0xc   : > { %p775_p4 = por %p765_p1, %p54_p0  ;;  %p456_p5 = scmp.ge.s32.totalorder %s703_s17, 1 }
   0xd   : > { %p780_p6 = por %p131_p3, %p54_p0  ;;  %p138_p7 = scmp.lt.s32.totalorder %s703_s17, 3 }
   0xe   : > { %s964_s22 = scalar_select %p775_p4, 1, 0 }
   0xf   : > { %s965_s23 = scalar_select %p780_p6, 1, 0 }
  0x10   : > { %p785_p8 = pnand %p456_p5, %p138_p7  ;;  %s705_s25 = smov [#allocation6]  }
  0x11   : > { %s154_s26 = sshll.u32 %s705_s25, 4  ;;  %s32_s28 = sadd.s32 1, %s699_s16  ;;  %s155_s26 = int_to_ptr.vmem [resolvable:$true] %s154_s26 }
  0x12   : > { %s966_s24 = scalar_select %p785_p8, 1, 0 }
  0x13   : > { %p487_p9 = pneg %p785_p8  ;;  %s559_s4 = scalar_lea.hbm %s955_s1, 1024 }
  0x14   : > { %p560_p12 = scmp.ne.s32.totalorder %s955_s1, %s559_s4  ;;  %p566_p5 = scmp.lt.u32.totalorder %s559_s4, %s955_s1 }
  0x15   : > { %p794_p11 = pnand %p487_p9, %p765_p1 }
  0x17   : > { %p561_p13 = pneg %p794_p11 }
  0x19   : > { %p562_p0 = pnand %p561_p13, %p560_p12 }
  0x1b   : > { %p563_p3 = pneg %p562_p0 }
  0x1d   : > { %p568_p7 = pnand %p566_p5, %p563_p3 }
  0x1f   : > { %571 = shalt.err (!%p568_p7)
}
  0x20   : > { %s572_s9 = scalar_lea.vmem %s155_s26, 1024  ;;  %p580_p1 = scmp.lt.s32.totalorder %s155_s26, %s155_s26 }
  0x21   : > { %p573_p9 = scmp.ne.s32.totalorder %s155_s26, %s572_s9  ;;  %p581_p4 = scmp.lt.s32.totalorder %s572_s9, %s572_s9 }
  0x23   : > { %p575_p10 = pnand %p573_p9, %p561_p13  ;;  %p582_p8 = por %p581_p4, %p580_p1 }
  0x25   : > { %p576_p6 = pneg %p575_p10 }
  0x27   : > { %p583_p2 = pnand %p582_p8, %p576_p6 }
  0x29   : > { %586 = shalt.err (!%p583_p2)
}
  0x2a   : > { %s706_s10 = smov 256   ;;  %s707_s11 = smov 16  }
  0x2b   : > { %490 = dma.hbm_to_vmem [thread:$0]  (!%p794_p11), %s955_s1, 1024, %s155_s26, [#allocation7], %s706_s10, %s706_s10, %s707_s11  }
  0x2c   : > { %p34_p1 = scmp.ge.s32.totalorder %s32_s28, 2  ;;  %s41_s25 = sadd.s32 1, %s691_s14 }
  0x2d   : > { %p48_p2 = scmp.ne.s32.totalorder %s691_s14, %s687_s13  ;;  %p49_p4 = scmp.eq.s32.totalorder %s703_s17, 0 }
  0x2e   : > { %s983_s28 = smov (%p34_p1, %s32_s28), 0  ;;  %p969_p8 = scmp.ne.s32.totalorder %s963_s21, 0 }
  0x2f   : > { %p821_p6 = por %p49_p4, %p48_p2  ;;  %s36_s27 = ssub.s32 %s699_s16, %s983_s28 }
  0x30   : > { %p827_p10 = por %p969_p8, %p48_p2  ;;  %p500_p12 = scmp.lt.s32.totalorder %s703_s17, 2 }
  0x31   : > { %p39_p11 = scmp.eq.s32.totalorder %s36_s27, 0  ;;  %s171_s26 = sand.u32 1, %s691_s14  }
  0x32   : > { %s459_s4 = sshll.u32 %s171_s26, 3  ;;  %s460_s6 = sshll.u32 %s699_s16, 7 }
  0x33   : > { %s836_s5 = scalar_select %p39_p11, %s691_s14, %s41_s25  }
  0x34   : > { %s842_s9 = scalar_lea.hbm %s954_s0, %s460_s6  ;;  %s175_s21 = scalar_lea.vmem [#allocation3], %s459_s4 }
  0x35   : > { %s183_s10 = sshll.u32 %s175_s21, 4  ;;  %p848_p13 = pnand %p500_p12, %p821_p6  ;;  %s844_s10 = int_to_ptr.vmem [resolvable:$true] %s183_s10 }
  0x36   : > { %s172_s18 = scalar_lea.sflag [#allocation4], %s171_s26  ;;  %s587_s19 = scalar_lea.hbm %s842_s9, 128 }
  0x37   : > { %p588_p0 = scmp.ne.s32.totalorder %s842_s9, %s587_s19  ;;  %p589_p3 = pneg %p848_p13 }
  0x38   : > { %s592_s4 = scalar_lea.hbm %s954_s0, 256  ;;  %p593_p9 = scmp.lt.u32.totalorder %s842_s9, %s954_s0 }
  0x39   : > { %p590_p5 = pnand %p589_p3, %p588_p0  ;;  %p594_p1 = scmp.lt.u32.totalorder %s592_s4, %s587_s19 }
  0x3a   : > { %p596_p4 = scmp.lt.u32.totalorder %s587_s19, %s842_s9 }
  0x3b   : > { %p591_p7 = pneg %p590_p5  ;;  %p595_p2 = por %p594_p1, %p593_p9 }
  0x3d   : > { %p597_p6 = por %p596_p4, %p595_p2 }
  0x3f   : > { %p598_p8 = pnand %p597_p6, %p591_p7 }
  0x41   : > { %601 = shalt.err (!%p598_p8)
}
  0x42   : > { %s602_s26 = scalar_lea.vmem %s844_s10, 128  ;;  %s708_s7 = smov [#allocation3]  }
  0x43   : > { %p603_p12 = scmp.ne.s32.totalorder %s844_s10, %s602_s26  ;;  %s607_s8 = sshll.u32 %s708_s7, 4  ;;  %s608_s8 = int_to_ptr.vmem [resolvable:$false] %s607_s8 }
  0x44   : > { %s609_s21 = scalar_lea.vmem %s608_s8, 256  ;;  %p610_p5 = scmp.lt.s32.totalorder %s844_s10, %s608_s8 }
  0x45   : > { %p605_p11 = pnand %p603_p12, %p589_p3  ;;  %p611_p9 = scmp.lt.s32.totalorder %s609_s21, %s602_s26 }
  0x47   : > { %p606_p0 = pneg %p605_p11  ;;  %p612_p1 = por %p611_p9, %p610_p5 }
  0x49   : > { %p613_p2 = pnand %p612_p1, %p606_p0 }
  0x4b   : > { %616 = shalt.err (!%p613_p2)
}
  0x4c   : > { %494 = dma.hbm_to_vmem [thread:$0]  (!%p848_p13), %s842_s9, 128, %s844_s10, %s172_s18  }
  0x4d   : > { %p972_p7 = scmp.ne.s32.totalorder %s966_s24, 0 }
  0x4e   : > { %s880_s19 = sand.u32 (!%p972_p7), 1, %s687_s13   ;;  %p973_p3 = scmp.ne.s32.totalorder (!%p972_p7), %s964_s22, 0 }
  0x4f   : > { %192 = sbr.rel (%p972_p7) target bundleno = 358 (0x166), region = 32  ;;  %s462_s25 = sshll.u32 (!%p972_p7), %s880_s19, 3 }
  0x50   : > { %s195_s27 = scalar_lea.sflag (!%p972_p7), [#allocation4], %s880_s19  ;;  %s198_s4 = scalar_lea.vmem (!%p972_p7), [#allocation3], %s462_s25 }
  0x56   : > { %670 = dma.done.wait (%p973_p3), %s195_s27, 128  }
  0x57   : > { %672 = vsyncadd (%p973_p3), %s195_s27, 4294967168  ;;  %p974_p13 = scmp.ne.s32.totalorder %s962_s20, 0 }
  0x59   : > { %674 = dma.done.wait (%p974_p13), [#allocation7], 1024  }
  0x5a   : > { %676 = vsyncadd (%p974_p13), [#allocation7], 4294966272  ;;  %v709_v0 = vmov 0.0   ;;  %v236_v1 = vld [vmem:[#allocation6 + $0x8] sm:$0xff]  ;;  %v238_v2 = vld [vmem:[#allocation6 + $0x18] sm:$0xff]  ;;  %vm243_vm0 = vcmask 261120   ;;  %v329_v14 = vlaneseq }
  0x5b   : > { %311 = vmatprep.mubr.f32.mxu0 %v709_v0  ;;  %v235_v3 = vld [vmem:[#allocation6] sm:$0xff]  ;;  %v471_v4 = vpack.c.bf16 %v238_v2, %v236_v1  ;;  %v237_v5 = vld [vmem:[#allocation6 + $0x10] sm:$0xff]  ;;  %v240_v6 = vld [vmem:[#allocation6 + $0x28] sm:$0xff]  ;;  %s468_s24 = sshll.u32 %s695_s15, 7  ;;  %s224_s9 = scalar_lea.vmem [#allocation8], %s462_s25 }
  0x5c   : > { %v242_v7 = vld [vmem:[#allocation6 + $0x38] sm:$0xff]  ;;  %v473_v8 = vpack.c.bf16 %v237_v5, %v235_v3  ;;  %v239_v10 = vld [vmem:[#allocation6 + $0x20] sm:$0xff]  ;;  %v241_v11 = vld [vmem:[#allocation6 + $0x30] sm:$0xff]  ;;  %v330_v15 = vshrl.u32 %v329_v14, 7  ;;  %s363_s10 = sshll.u32 %s224_s9, 4  ;;  %s904_s29 = scalar_lea.hbm %s957_s3, %s468_s24  ;;  %s906_s10 = int_to_ptr.vmem [resolvable:$true] %s363_s10 }
  0x5d   : > { %v475_v9 = vpack.c.bf16 %v242_v7, %v240_v6  ;;  %472 = vmatprep.subr.bf16.mxu0 %v471_v4  ;;  %v477_v12 = vpack.c.bf16 %v241_v11, %v239_v10  ;;  %v232_v13 = vld [vmem:[%s198_s4] sm:$0xff]  ;;  %s350_s6 = scalar_lea.sflag [#allocation5], %s880_s19  ;;  %s617_s15 = scalar_lea.vmem %s906_s10, 128 }
  0x5e   : > { %474 = vmatpush1.bf16.msra.mxu0 %v473_v8  ;;  %v335_v16 = vsub.s32 1, %v330_v15  ;;  %v327_v17 = vld [vmem:[%s956_s2] sm:$0x3]  ;;  %v331_v25 = vsub.s32 0, %v330_v15  ;;  %p618_p4 = scmp.ne.s32.totalorder %s906_s10, %s617_s15  ;;  %s710_s26 = smov [#allocation8]  }
  0x5f   : > { %476 = vmatprep.subr.bf16.mxu0 %v475_v9  ;;  %s621_s7 = sshll.u32 %s710_s26, 4  ;;  %s622_s7 = int_to_ptr.vmem [resolvable:$false] %s621_s7 }
  0x60   : > { %v336_v18 = vrot.slane %v327_v17, %v335_v16  ;;  %v332_v26 = vrot.slane %v327_v17, %v331_v25  ;;  %p619_p6 = pnand %p618_p4, %p827_p10  ;;  %s623_s8 = scalar_lea.vmem %s622_s7, 256 }
  0x61   : > { %p624_p12 = scmp.lt.s32.totalorder %s906_s10, %s622_s7  ;;  %p625_p11 = scmp.lt.s32.totalorder %s623_s8, %s617_s15 }
  0x62   : > { %478 = vmatpush1.bf16.msra.mxu0 %v477_v12  ;;  %p620_p8 = pneg %p619_p6 }
  0x63   : > { %p626_p0 = por %p625_p11, %p624_p12 }
  0x65   : > { %465 = vmatmul.mubr.msk.f32.vlgmr.msra.gmra.mrb[0].mxu0 %vm243_vm0, %v232_v13  ;;  %p627_p5 = pnand %p626_p0, %p620_p8 }
 0x138   : > { %v313_v19 = vpop.f32.mrb[0].mxu0 }
 0x139   : > { %v315_v20 = vpop.f32.mrb[1].mxu0  ;;  %v339_v27 = vadd.f32 %v332_v26, %v313_v19 }
 0x13a   : > { %v340_v21 = vadd.f32 %v336_v18, %v315_v20 }
 0x13c   : > { %v466_v22 = vmul.f32 -1.442695, %v340_v21 }
 0x13e   : > { %555 = vpow2.f32 %v466_v22 }
 0x148   : > { %v556_v23 = vpop.eup %555 }
 0x149   : > { %v344_v24 = vadd.f32 1.0, %v556_v23 }
 0x14b   : > { %557 = vrcp.f32 %v344_v24 }
 0x155   : > { %v558_v28 = vpop.eup %557 }
 0x156   : > { %v347_v29 = vmul.f32 %v558_v28, %v339_v27 }
 0x158   : > { %348 = vst.msk [vmem:[%s224_s9] sm:$0xff] %vm243_vm0, %v347_v29 }
 0x159   : > { %630 = shalt.err (!%p627_p5)
}
 0x15a   : > { %s631_s21 = scalar_lea.hbm %s904_s29, 128  ;;  %s635_s27 = scalar_lea.hbm %s957_s3, 256 }
 0x15b   : > { %p632_p9 = scmp.ne.s32.totalorder %s904_s29, %s631_s21  ;;  %p636_p7 = scmp.lt.u32.totalorder %s904_s29, %s957_s3 }
 0x15c   : > { %p637_p3 = scmp.lt.u32.totalorder %s635_s27, %s631_s21  ;;  %p639_p4 = scmp.lt.u32.totalorder %s631_s21, %s904_s29 }
 0x15d   : > { %p633_p1 = pnand %p632_p9, %p827_p10 }
 0x15e   : > { %p638_p13 = por %p637_p3, %p636_p7 }
 0x15f   : > { %p634_p2 = pneg %p633_p1 }
 0x160   : > { %p640_p6 = por %p639_p4, %p638_p13 }
 0x162   : > { %p641_p8 = pnand %p640_p6, %p634_p2 }
 0x164   : > { %644 = shalt.err (!%p641_p8)
}
 0x165   : > { %485 = dma.vmem_to_hbm [thread:$0]  (%p827_p10), %s906_s10, 128, %s904_s29, %s350_s6  }
 0x166 PF: > { %s375_s22 = sand.u32 1, %s683_s12   ;;  %p975_p12 = scmp.ne.s32.totalorder %s965_s23, 0 }
 0x167   : > { %p976_p11 = scmp.ge.s32.totalorder %s703_s17, 2  ;;  %s376_s24 = scalar_lea.sflag [#allocation5], %s375_s22 }
 0x169   : > { %p496_p0 = pnand %p976_p11, %p975_p12 }
 0x16b   : > { %678 = dma.done.wait (!%p496_p0), %s376_s24, 128  }
 0x16c   : > { %680 = vsyncadd (!%p496_p0), %s376_s24, 4294967168  ;;  %s20_s17 = sadd.s32 1, %s703_s17   ;;  %s977_s12 = smov %s687_s13 }
 0x16d   : > { %p17_p5 = scmp.ge.s32.totalorder %s20_s17, 4   ;;  %s978_s13 = smov %s691_s14 }
 0x16e   : > { %s979_s14 = smov %s836_s5  ;;  %s980_s15 = smov %s699_s16 }
 0x16f   : > { %s981_s16 = smov %s983_s28  ;;  %19 = sbr.rel (!%p17_p5) target bundleno = 7 (0x7), region = 90 }
 0x176   :  { %381 = vsyncpa [#allocation4], 1 }
 0x177   :  { %383 = vsyncpa [#allocation4 + $0x1], 1 }
 0x178   :  { %384 = vsyncpa [#allocation7], 1 }
 0x179   :  { %385 = vsyncpa [#allocation5], 1 }
 0x17a   :  { %387 = vsyncpa [#allocation5 + $0x1], 1 }

</bundles_post_ra>
